<compile_context>
chip_gen: v6e
topology: v6e:2x2x1
jax: 0.10.0
libtpu: 0.0.40
codegen_flags: <defaults>
</compile_context>

<pallas_src>
import functools

import jax
import jax.numpy as jnp
from jax.experimental import pallas as pl
from jax.experimental.pallas import tpu as pltpu


def _yolo_kernel(p_ref, prm_ref, io_ref, *, nx, stride, s_tile):
    x = p_ref[...].astype(jnp.float32)             # (R, T) block, math in f32
    scale  = prm_ref[:, 0:1]                       # per-row affine scale
    is_exp = prm_ref[:, 1:2] > 0.0                 # channels 2,3: exp()
    is_x   = prm_ref[:, 2:3]                       # channel 0: add x*stride
    is_y   = prm_ref[:, 3:4]                       # channel 1: add y*stride
    force1 = prm_ref[:, 4:5] > 0.0                 # nc==1: io[..., 5] = 1

    # Single exp per element; sigmoid rows get 1/(1+exp(-x)) via the EUP
    # approximate reciprocal (rides an otherwise idle EUP slot).
    e = jnp.exp(jnp.where(is_exp, x, -x))
    act = jnp.where(is_exp, e, pl.reciprocal(1.0 + e, approx=True))

    # Spatial grid offsets computed in-kernel (float div/mod, exact here since
    # S < 2^23 and the 0.5 bias keeps floor() away from integer boundaries).
    lane = jax.lax.broadcasted_iota(jnp.int32, x.shape, 1).astype(jnp.float32)
    s = lane + (pl.program_id(1) * s_tile).astype(jnp.float32)
    ys = jnp.floor((s + 0.5) * (1.0 / nx))
    xs = s - ys * nx
    off = (is_x * xs + is_y * ys) * stride

    out = act * scale + off
    out = jnp.where(force1, 1.0, out)
    io_ref[...] = out.astype(io_ref.dtype)


def yolo_layer_forward(p, anchors, nc, img_size, *, max_block_bytes=2 * 1024 * 1024):
    """Inference forward of YOLOLayer.

    p:        (bs, na*(nc+5), ny, nx), NCHW as in PyTorch (any float dtype).
    anchors:  (na, 2).
    Returns (io, p_perm) matching the PyTorch module:
      io:     (bs, na*ny*nx, nc+5)
      p_perm: (bs, na, ny, nx, nc+5)   (raw logits, original dtype)
    """
    bs, _, ny, nx = p.shape
    anchors = jnp.asarray(anchors, jnp.float32)
    na = anchors.shape[0]
    C = nc + 5
    R = na * C
    S = ny * nx
    stride = float(img_size) / max(nx, ny)

    # Channel-major view; keep the input dtype (bf16 inputs stay bf16 in HBM).
    p_cm = p.reshape(bs, R, S)

    # Tiny per-row parameter table: [scale, is_exp, is_x, is_y, force_one].
    # anchor_wh = anchors/stride and io[..., :4] *= stride  ->  net wh scale = anchors.
    c_idx = jnp.tile(jnp.arange(C), na)
    a_idx = jnp.repeat(jnp.arange(na), C)
    scale = jnp.where(c_idx < 2, jnp.float32(stride),
            jnp.where(c_idx == 2, anchors[a_idx, 0],
            jnp.where(c_idx == 3, anchors[a_idx, 1], 1.0)))
    is_exp = ((c_idx == 2) | (c_idx == 3)).astype(jnp.float32)
    is_x = (c_idx == 0).astype(jnp.float32)
    is_y = (c_idx == 1).astype(jnp.float32)
    force1 = ((c_idx == 5).astype(jnp.float32) if nc == 1
              else jnp.zeros((R,), jnp.float32))
    params = jnp.stack([scale, is_exp, is_x, is_y, force1], axis=1)  # (R, 5)

    # Fat, lane-dense spatial tiles: full S when it fits the per-block budget
    # (full-extent blocks are allowed even when S % 128 != 0), otherwise the
    # largest 128-multiple tile under the budget (Pallas masks the ragged edge
    # block).  ~2 MiB blocks keep double-buffered in+out well inside v5e's
    # 16 MiB / v7x's 32 MiB scoped VMEM.
    max_lanes = max(128, (max_block_bytes // (R * 4)) // 128 * 128)
    s_tile = S if S <= max_lanes else max_lanes
    grid = (bs, pl.cdiv(S, s_tile))

    kernel = functools.partial(_yolo_kernel, nx=nx, stride=stride, s_tile=s_tile)
    io_cm = pl.pallas_call(
        kernel,
        out_shape=jax.ShapeDtypeStruct((bs, R, S), p.dtype),
        grid=grid,
        in_specs=[
            pl.BlockSpec((None, R, s_tile), lambda b, t: (b, 0, t)),
            pl.BlockSpec((R, 5), lambda b, t: (0, 0)),
        ],
        out_specs=pl.BlockSpec((None, R, s_tile), lambda b, t: (b, 0, t)),
        compiler_params=pltpu.CompilerParams(
            dimension_semantics=("parallel", "parallel"),
            vmem_limit_bytes=32 * 1024 * 1024),
    )(p_cm, params)

    # ---- layout glue back to PyTorch conventions (XLA transposes) ----------
    # TODO(synk): these two transposes re-read/re-write the full tensors; a
    # consumer accepting the channel-major layout removes them entirely.
    p_perm = p.reshape(bs, na, C, ny, nx).transpose(0, 1, 3, 4, 2)
    io = (io_cm.reshape(bs, na, C, ny, nx)
                .transpose(0, 1, 3, 4, 2)
                .reshape(bs, -1, C))
    return io, p_perm


def yolo_layer_ref(p, anchors, nc, img_size):
    """Pure-JAX reference mirroring the PyTorch forward (inference branch)."""
    bs, _, ny, nx = p.shape
    anchors = jnp.asarray(anchors, jnp.float32)
    na = anchors.shape[0]
    C = nc + 5
    stride = float(img_size) / max(nx, ny)
    pv = p.reshape(bs, na, C, ny, nx).transpose(0, 1, 3, 4, 2)
    yv, xv = jnp.meshgrid(jnp.arange(ny), jnp.arange(nx), indexing="ij")
    grid_xy = jnp.stack((xv, yv), 2).astype(jnp.float32).reshape(1, 1, ny, nx, 2)
    anchor_wh = (anchors / stride).reshape(1, na, 1, 1, 2)
    xy = (jax.nn.sigmoid(pv[..., 0:2]) + grid_xy) * stride
    wh = jnp.exp(pv[..., 2:4]) * anchor_wh * stride
    rest = jax.nn.sigmoid(pv[..., 4:])
    io = jnp.concatenate([xy, wh, rest], axis=-1)
    if nc == 1:
        io = io.at[..., 5].set(1.0)
    return io.reshape(bs, -1, C), pv


if __name__ == "__main__":
    key = jax.random.PRNGKey(0)

    # Deterministic synthetic "module parameters" and input.
    nc = 3                                      # number of classes
    anchors = jnp.array([[10.0, 13.0], [16.0, 30.0], [33.0, 23.0]], jnp.float32)
    na = anchors.shape[0]
    bs, ny, nx = 2, 16, 16
    img_size = 128                              # stride = 128 / 16 = 8
    p = jax.random.normal(key, (bs, na * (nc + 5), ny, nx), jnp.float32)

    io, p_perm = yolo_layer_forward(p, anchors, nc, img_size)
    jax.block_until_ready((io, p_perm))

    io_ref, p_perm_ref = yolo_layer_ref(p, anchors, nc, img_size)
    assert io.shape == (bs, na * ny * nx, nc + 5)
    assert p_perm.shape == (bs, na, ny, nx, nc + 5)
    assert p_perm.dtype == p.dtype
    assert jnp.allclose(p_perm, p_perm_ref, atol=1e-6, rtol=1e-6)
    # 5e-3 tolerance: the sigmoid denominator uses the EUP approximate
    # reciprocal (pl.reciprocal(..., approx=True)), ~1e-3 relative error.
    assert jnp.allclose(io, io_ref, atol=5e-3, rtol=5e-3)

    # Also exercise the nc == 1 special case (io[..., 5] forced to 1).
    p1 = jax.random.normal(jax.random.PRNGKey(1), (bs, na * 6, ny, nx), jnp.float32)
    io1, pp1 = yolo_layer_forward(p1, anchors, 1, img_size)
    io1_ref, pp1_ref = yolo_layer_ref(p1, anchors, 1, img_size)
    jax.block_until_ready((io1, pp1))
    assert jnp.allclose(pp1, pp1_ref, atol=1e-6, rtol=1e-6)
    assert jnp.allclose(io1, io1_ref, atol=5e-3, rtol=5e-3)

    print("KERNEL_OK")
</pallas_src>

<mosaic_0001>
module attributes {stable_mosaic.version = 11 : i64} {
  func.func @_yolo_kernel(%arg0: i32, %arg1: i32, %arg2: memref<1x24x256xf32, #tpu.memory_space<vmem>>, %arg3: memref<24x5xf32, #tpu.memory_space<vmem>>, %arg4: memref<1x24x256xf32, #tpu.memory_space<vmem>>) attributes {dimension_semantics = [#tpu.dimension_semantics<parallel>, #tpu.dimension_semantics<parallel>], iteration_bounds = array<i64: 2, 1>, scalar_prefetch = 0 : i64, scratch_operands = 0 : i64, tpu.core_type = #tpu.core_type<tc>, window_params = [{transform_indices = @transform_0, window_bounds = array<i64: 1, 24, 256>}, {pipeline_mode = #tpu.pipeline_mode<synchronous>, transform_indices = @transform_1, window_bounds = array<i64: 24, 5>}, {transform_indices = @transform_2, window_bounds = array<i64: 1, 24, 256>}]} {
    %c0 = arith.constant 0 : index
    %c0_0 = arith.constant 0 : index
    %c0_1 = arith.constant 0 : index
    %0 = vector.load %arg2[%c0, %c0_0, %c0_1] : memref<1x24x256xf32, #tpu.memory_space<vmem>>, vector<1x24x256xf32>
    %1 = vector.shape_cast %0 : vector<1x24x256xf32> to vector<24x256xf32>
    %c0_2 = arith.constant 0 : index
    %c0_3 = arith.constant 0 : index
    %2 = vector.load %arg3[%c0_2, %c0_3] : memref<24x5xf32, #tpu.memory_space<vmem>>, vector<24x1xf32>
    %c0_4 = arith.constant 0 : index
    %c1 = arith.constant 1 : index
    %3 = vector.load %arg3[%c0_4, %c1] : memref<24x5xf32, #tpu.memory_space<vmem>>, vector<24x1xf32>
    %cst = arith.constant 0.000000e+00 : f32
    %4 = vector.broadcast %cst : f32 to vector<24x1xf32>
    %5 = arith.cmpf ogt, %3, %4 : vector<24x1xf32>
    %c0_5 = arith.constant 0 : index
    %c2 = arith.constant 2 : index
    %6 = vector.load %arg3[%c0_5, %c2] : memref<24x5xf32, #tpu.memory_space<vmem>>, vector<24x1xf32>
    %c0_6 = arith.constant 0 : index
    %c3 = arith.constant 3 : index
    %7 = vector.load %arg3[%c0_6, %c3] : memref<24x5xf32, #tpu.memory_space<vmem>>, vector<24x1xf32>
    %c0_7 = arith.constant 0 : index
    %c4 = arith.constant 4 : index
    %8 = vector.load %arg3[%c0_7, %c4] : memref<24x5xf32, #tpu.memory_space<vmem>>, vector<24x1xf32>
    %cst_8 = arith.constant 0.000000e+00 : f32
    %9 = vector.broadcast %cst_8 : f32 to vector<24x1xf32>
    %10 = arith.cmpf ogt, %8, %9 : vector<24x1xf32>
    %cst_9 = arith.constant 0.000000e+00 : f32
    %11 = vector.broadcast %cst_9 : f32 to vector<24x256xf32>
    %12 = arith.subf %11, %1 : vector<24x256xf32>
    %13 = vector.shape_cast %5 : vector<24x1xi1> to vector<24x1xi1>
    %14 = vector.broadcast %13 : vector<24x1xi1> to vector<24x256xi1>
    %15 = arith.select %14, %1, %12 : vector<24x256xi1>, vector<24x256xf32>
    %16 = math.exp %15 : vector<24x256xf32>
    %cst_10 = arith.constant 1.000000e+00 : f32
    %17 = vector.broadcast %cst_10 : f32 to vector<24x256xf32>
    %18 = arith.addf %17, %16 : vector<24x256xf32>
    %19 = tpu.reciprocal %18 {approx = true} : vector<24x256xf32> -> vector<24x256xf32>
    %20 = vector.shape_cast %5 : vector<24x1xi1> to vector<24x1xi1>
    %21 = vector.broadcast %20 : vector<24x1xi1> to vector<24x256xi1>
    %22 = arith.select %21, %16, %19 : vector<24x256xi1>, vector<24x256xf32>
    %23 = tpu.iota {dimensions = array<i32: 1>} : vector<24x256xi32>
    %24 = arith.sitofp %23 : vector<24x256xi32> to vector<24x256xf32>
    %c256_i32 = arith.constant 256 : i32
    %25 = arith.muli %arg1, %c256_i32 : i32
    %26 = arith.sitofp %25 : i32 to f32
    %27 = vector.broadcast %26 : f32 to vector<24x256xf32>
    %28 = arith.addf %24, %27 : vector<24x256xf32>
    %cst_11 = arith.constant 5.000000e-01 : f32
    %29 = vector.broadcast %cst_11 : f32 to vector<24x256xf32>
    %30 = arith.addf %28, %29 : vector<24x256xf32>
    %cst_12 = arith.constant 6.250000e-02 : f32
    %31 = vector.broadcast %cst_12 : f32 to vector<24x256xf32>
    %32 = arith.mulf %30, %31 : vector<24x256xf32>
    %33 = math.floor %32 : vector<24x256xf32>
    %cst_13 = arith.constant 1.600000e+01 : f32
    %34 = vector.broadcast %cst_13 : f32 to vector<24x256xf32>
    %35 = arith.mulf %33, %34 : vector<24x256xf32>
    %36 = arith.subf %28, %35 : vector<24x256xf32>
    %37 = vector.broadcast %6 : vector<24x1xf32> to vector<24x256xf32>
    %38 = arith.mulf %37, %36 : vector<24x256xf32>
    %39 = vector.broadcast %7 : vector<24x1xf32> to vector<24x256xf32>
    %40 = arith.mulf %39, %33 : vector<24x256xf32>
    %41 = arith.addf %38, %40 : vector<24x256xf32>
    %cst_14 = arith.constant 8.000000e+00 : f32
    %42 = vector.broadcast %cst_14 : f32 to vector<24x256xf32>
    %43 = arith.mulf %41, %42 : vector<24x256xf32>
    %44 = vector.broadcast %2 : vector<24x1xf32> to vector<24x256xf32>
    %45 = arith.mulf %22, %44 : vector<24x256xf32>
    %46 = arith.addf %45, %43 : vector<24x256xf32>
    %cst_15 = arith.constant 1.000000e+00 : f32
    %47 = vector.shape_cast %10 : vector<24x1xi1> to vector<24x1xi1>
    %48 = vector.broadcast %47 : vector<24x1xi1> to vector<24x256xi1>
    %49 = vector.broadcast %cst_15 : f32 to vector<24x256xf32>
    %50 = arith.select %48, %49, %46 : vector<24x256xi1>, vector<24x256xf32>
    %c0_16 = arith.constant 0 : index
    %c0_17 = arith.constant 0 : index
    %c0_18 = arith.constant 0 : index
    %51 = vector.load %arg4[%c0_16, %c0_17, %c0_18] : memref<1x24x256xf32, #tpu.memory_space<vmem>>, vector<1x24x256xf32>
    %52 = vector.shape_cast %51 : vector<1x24x256xf32> to vector<24x256xf32>
    %53 = vector.shape_cast %50 : vector<24x256xf32> to vector<1x24x256xf32>
    tpu.vector_store %arg4[%c0_16, %c0_17, %c0_18], %53 {strides = array<i32>} : memref<1x24x256xf32, #tpu.memory_space<vmem>>, vector<1x24x256xf32>,
    return
  }
  func.func @transform_0(%arg0: i32, %arg1: i32) -> (i32, i32, i32) {
    %c0_i32 = arith.constant 0 : i32
    %c0_i32_0 = arith.constant 0 : i32
    return %arg0, %c0_i32, %arg1 : i32, i32, i32
  }
  func.func @transform_1(%arg0: i32, %arg1: i32) -> (i32, i32) {
    %c0_i32 = arith.constant 0 : i32
    %c0_i32_0 = arith.constant 0 : i32
    %c0_i32_1 = arith.constant 0 : i32
    return %c0_i32, %c0_i32_0 : i32, i32
  }
  func.func @transform_2(%arg0: i32, %arg1: i32) -> (i32, i32, i32) {
    %c0_i32 = arith.constant 0 : i32
    %c0_i32_0 = arith.constant 0 : i32
    return %arg0, %c0_i32, %arg1 : i32, i32, i32
  }
}

</mosaic_0001>

<bundles_post_ra>
// kernel: tpu_custom_call.1
= control target key start
LH: loop header
LB: loop body
LE: loop exit
PB: predicated region body
PF: predicated region fallthrough
CT: control target
= control target key end

     0   :  { %7 = vsyncpa [#allocation3], 0  ;;  %s943_s0 = inlined_call_operand.hbm [shape: f32[2,24,256], index: 0, kind: input, shape index: {}]   ;;  %s944_s1 = inlined_call_operand.vmem [shape: f32[24,5], index: 1, kind: input, shape index: {}]   ;;  %s945_s2 = inlined_call_operand.hbm [shape: f32[2,24,256], index: 2, kind: output, shape index: {}]  }
   0x1   :  { %9 = vsyncpa [#allocation3 + $0x1], 0 }
   0x2   :  { %10 = vsyncpa [#allocation4], 0 }
   0x3   :  { %12 = vsyncpa [#allocation4 + $0x1], 0  ;;  %s727_s9 = smov 0   ;;  %s729_s10 = smov 0  }
   0x4   :  { %s731_s11 = smov 0   ;;  %s733_s12 = smov 0  }
   0x5   :  { %s735_s13 = smov 0   ;;  %s737_s14 = smov 0  }
   0x6 LB: > { %s473_s15 = sadd.s32 4294967295, %s699_s14   ;;  %s474_s16 = sadd.s32 4294967294, %s699_s14   ;;  %s699_s14 = sphi %s737_s14, %s18_s14   ;;  %s695_s13 = sphi %s735_s13, %s956_s13   ;;  %s691_s12 = sphi %s733_s12, %s955_s12   ;;  %s687_s11 = sphi %s731_s11, %s954_s11   ;;  %s683_s10 = sphi %s729_s10, %s953_s10   ;;  %s679_s9 = sphi %s727_s9, %s952_s9  }
   0x7   : > { %s30_s17 = sadd.s32 1, %s695_s13  ;;  %s39_s18 = sadd.s32 1, %s687_s11 }
   0x8   : > { %p32_p0 = scmp.ge.s32.totalorder %s30_s17, 2  ;;  %p46_p1 = scmp.ne.s32.totalorder %s687_s11, %s683_s10 }
   0x9   : > { %p47_p2 = scmp.eq.s32.totalorder %s699_s14, 0  ;;  %p52_p3 = scmp.ne.s32.totalorder %s683_s10, %s679_s9 }
   0xa   : > { %s958_s17 = smov (%p32_p0, %s30_s17), 0  ;;  %p53_p5 = scmp.eq.s32.totalorder %s473_s15, 0 }
   0xb   : > { %p768_p4 = por %p47_p2, %p46_p1  ;;  %s34_s20 = ssub.s32 %s695_s13, %s958_s17 }
   0xc   : > { %p99_p6 = scmp.eq.s32.totalorder %s473_s15, 1  ;;  %p37_p7 = scmp.eq.s32.totalorder %s34_s20, 0 }
   0xd   : > { %p774_p8 = por %p53_p5, %p52_p3  ;;  %p105_p10 = scmp.eq.s32.totalorder %s474_s16, 1 }
   0xe   : > { %p778_p9 = por %p99_p6, %p46_p1  ;;  %p498_p13 = scmp.lt.s32.totalorder %s699_s14, 2 }
   0xf   : > { %s783_s23 = scalar_select %p37_p7, %s687_s11, %s39_s18  }
  0x10   : > { %p785_p11 = por %p105_p10, %p52_p3  ;;  %s128_s25 = sand.u32 1, %s687_s11  }
  0x11   : > { %s482_s26 = smul.u32 48, %s128_s25  ;;  %p795_p0 = pnand %p498_p13, %p768_p4 }
  0x12   : > { %s483_s27 = smul.u32 768, %s695_s13  ;;  %p478_p1 = scmp.ge.s32.totalorder %s699_s14, 1 }
  0x13   : > { %s132_s4 = scalar_lea.vmem [#allocation2], %s482_s26  ;;  %s129_s6 = scalar_lea.sflag [#allocation3], %s128_s25 }
  0x14   : > { %s140_s3 = scalar_lea.hbm %s943_s0, %s483_s27  ;;  %s141_s5 = sshll.u32 %s132_s4, 4  ;;  %s142_s5 = int_to_ptr.vmem [resolvable:$true] %s141_s5 }
  0x15   : > { %p593_p2 = pneg %p795_p0  ;;  %s604_s7 = scalar_lea.vmem %s142_s5, 768 }
  0x16   : > { %p605_p3 = scmp.ne.s32.totalorder %s142_s5, %s604_s7  ;;  %s701_s8 = smov [#allocation2]  }
  0x17   : > { %s609_s15 = sshll.u32 %s701_s8, 4  ;;  %s610_s15 = int_to_ptr.vmem [resolvable:$false] %s609_s15 }
  0x18   : > { %p607_p5 = pnand %p605_p3, %p593_p2  ;;  %s611_s16 = scalar_lea.vmem %s610_s15, 1536 }
  0x19   : > { %p612_p4 = scmp.lt.s32.totalorder %s142_s5, %s610_s15  ;;  %p613_p7 = scmp.lt.s32.totalorder %s611_s16, %s604_s7 }
  0x1a   : > { %p608_p6 = pneg %p607_p5 }
  0x1b   : > { %p614_p10 = por %p613_p7, %p612_p4 }
  0x1d   : > { %p615_p13 = pnand %p614_p10, %p608_p6 }
  0x1f   : > { %618 = shalt.err (!%p615_p13)
}
  0x20   : > { %s702_s18 = smov 256   ;;  %s703_s19 = smov 16  }
  0x21   : > { %493 = dma.hbm_to_vmem [thread:$0]  (!%p795_p0), %s140_s3, 768, %s142_s5, %s129_s6, %s702_s18, %s702_s18, %s703_s19  }
  0x22   : > { %p149_p12 = scmp.lt.s32.totalorder %s699_s14, 3 }
  0x24   : > { %p150_p2 = pnand %p478_p1, %p149_p12 }
  0x25   : > { %s811_s20 = sand.u32 (!%p150_p2), 1, %s683_s10  }
  0x26   : > { %153 = sbr.rel (%p150_p2) target bundleno = 230 (0xe6), region = 28  ;;  %s156_s26 = scalar_lea.sflag (!%p150_p2), [#allocation3], %s811_s20 }
  0x27   : > { %s484_s25 = smul.u32 (!%p150_p2), 48, %s811_s20 }
  0x29   : > { %s817_s27 = scalar_lea.vmem (!%p150_p2), [#allocation2], %s484_s25 }
  0x2b   : > { %670 = dma.done.wait (%p774_p8), %s156_s26, 768  }
  0x2c   : > { %672 = vsyncadd (%p774_p8), %s156_s26, 4294966528  ;;  %v704_v0 = vmov 1   ;;  %v190_v1 = vld [vmem:[%s944_s1 + $0x10] sm:$0xff]  ;;  %v188_v2 = vld [vmem:[%s944_s1] sm:$0xff]  ;;  %v705_v4 = vmov 0   ;;  %v706_v8 = vmov 2   ;;  %v251_v11 = vlaneseq }
  0x2d   : > { %558 = vset.pattern.permute.xlu1 %v704_v0  ;;  %557 = vset.pattern.permute.xlu0 %v704_v0  ;;  %v189_v3 = vld [vmem:[%s944_s1 + $0x8] sm:$0xff]  ;;  %vm193_vm0 = vcmp.gt.f32.partialorder %v190_v1, 0.0  ;;  %vm191_vm1 = vcmp.gt.f32.partialorder %v188_v2, 0.0  ;;  %v707_v9 = vmov 3   ;;  %v708_v10 = vmov 4   ;;  %v186_v12 = vld [vmem:[%s817_s27 + $0x20] sm:$0xff] }
  0x2e   : > { %vm192_vm2 = vcmp.gt.f32.partialorder %v189_v3, 0.0  ;;  %v202_v5 = vsel %vm193_vm0, 1, %v705_v4  ;;  %v200_v6 = vsel %vm191_vm1, 1, %v705_v4  ;;  %v187_v13 = vld [vmem:[%s817_s27 + $0x28] sm:$0xff]  ;;  %v182_v14 = vld [vmem:[%s817_s27] sm:$0xff]  ;;  %v836_v16 = vand.u32 127, %v251_v11 }
  0x2f   : > { %210 = vperm.xlu1 %558, %v202_v5   ;;  %204 = vperm.xlu0 %557, %v200_v6   ;;  %v201_v7 = vsel %vm192_vm2, 1, %v705_v4  ;;  %v183_v15 = vld [vmem:[%s817_s27 + $0x8] sm:$0xff]  ;;  %v198_v17 = vsub.f32 0.0, %v186_v12  ;;  %v199_v18 = vsub.f32 0.0, %v187_v13  ;;  %v194_v19 = vsub.f32 0.0, %v182_v14  ;;  %v184_v21 = vld [vmem:[%s817_s27 + $0x10] sm:$0xff] }
  0x30   : > { %v195_v20 = vsub.f32 0.0, %v183_v15  ;;  %v185_v22 = vld [vmem:[%s817_s27 + $0x18] sm:$0xff]  ;;  %v253_v25 = vadd.s32 128, %v836_v16  ;;  %v196_v26 = vsub.f32 0.0, %v184_v21  ;;  %v254_v37 = vcvt.s32.f32 %v836_v16  ;;  %s179_s21 = scalar_lea.vmem [#allocation5], %s484_s25  ;;  %s485_s7 = smul.u32 768, %s691_s12 }
  0x31   : > { %v197_v27 = vsub.f32 0.0, %v185_v22  ;;  %s386_s6 = sshll.u32 %s179_s21, 4  ;;  %s371_s16 = scalar_lea.sflag [#allocation4], %s811_s20  ;;  %s888_s6 = int_to_ptr.vmem [resolvable:$true] %s386_s6 }
  0x32   : > { %v255_v38 = vcvt.s32.f32 %v253_v25  ;;  %v261_v44 = vadd.f32 0.5, %v254_v37  ;;  %s895_s15 = scalar_lea.hbm %s945_s2, %s485_s7  ;;  %s619_s18 = scalar_lea.vmem %s888_s6, 768 }
  0x33   : > { %559 = vset.pattern.permute.xlu1 %v706_v8  ;;  %207 = vperm.xlu0 %557, %v201_v7   ;;  %p620_p8 = scmp.ne.s32.totalorder %s888_s6, %s619_s18  ;;  %s709_s19 = smov [#allocation5]  }
  0x34   : > { %273 = vperm.xlu1 %559, %v188_v2   ;;  %v262_v45 = vadd.f32 0.5, %v255_v38  ;;  %v263_v47 = vmul.f32 0.0625, %v261_v44  ;;  %s623_s25 = sshll.u32 %s709_s19, 4  ;;  %s624_s25 = int_to_ptr.vmem [resolvable:$false] %s623_s25 }
  0x35   : > { %p621_p12 = pnand %p620_p8, %p778_p9  ;;  %s625_s26 = scalar_lea.vmem %s624_s25, 1536 }
  0x36   : > { %v264_v48 = vmul.f32 0.0625, %v262_v45  ;;  %v265_v50 = vfloor.f32 %v263_v47  ;;  %p626_p1 = scmp.lt.s32.totalorder %s888_s6, %s624_s25  ;;  %p627_p3 = scmp.lt.s32.totalorder %s625_s26, %s619_s18 }
  0x37   : > { %560 = vset.pattern.permute.xlu0 %v706_v8  ;;  %p622_p0 = pneg %p621_p12 }
  0x38   : > { %283 = vperm.xlu1 %559, %v190_v1   ;;  %278 = vperm.xlu0 %560, %v189_v3   ;;  %v266_v51 = vfloor.f32 %v264_v48  ;;  %v267_v61 = vmul.f32 16.0, %v265_v50  ;;  %p628_p5 = por %p627_p3, %p626_p1 }
  0x3a   : > { %v268_v62 = vmul.f32 16.0, %v266_v51  ;;  %p629_p6 = pnand %p628_p5, %p622_p0 }
  0x3c   : > { %561 = vset.pattern.permute.xlu1 %v707_v9  ;;  %562 = vset.pattern.permute.xlu0 %v707_v9 }
  0x3d   : > { %293 = vperm.xlu1 %561, %v188_v2   ;;  %297 = vperm.xlu0 %562, %v189_v3  }
  0x41   : > { %301 = vperm.xlu1 %561, %v190_v1   ;;  %564 = vset.pattern.permute.xlu0 %v705_v4 }
  0x42   : > { %327 = vperm.xlu0 %564, %v189_v3  }
  0x45   : > { %563 = vset.pattern.permute.xlu1 %v705_v4 }
  0x46   : > { %323 = vperm.xlu1 %563, %v188_v2   ;;  %566 = vset.pattern.permute.xlu0 %v708_v10 }
  0x47   : > { %350 = vperm.xlu0 %566, %v201_v7  }
  0x4a   : > { %331 = vperm.xlu1 %563, %v190_v1  }
  0x4e   : > { %565 = vset.pattern.permute.xlu1 %v708_v10 }
  0x4f   : > { %347 = vperm.xlu1 %565, %v200_v6   ;;  %v270_v6 = vsub.f32 %v255_v38, %v268_v62 }
  0x53   : > { %353 = vperm.xlu1 %565, %v202_v5   ;;  %v269_v5 = vsub.f32 %v254_v37, %v267_v61 }
  0xaa   : > { %v840_v23 = vpop.permute.xlu1 %210  ;;  %v842_v24 = vpop.permute.xlu0 %204 }
  0xab   : > { %vm214_vm3 = vcmp.eq.s32.totalorder %v840_v23, 1  ;;  %vm212_vm4 = vcmp.eq.s32.totalorder %v842_v24, 1 }
  0xac   : > { %v219_v28 = vsel %vm214_vm3, %v186_v12, %v198_v17  ;;  %v220_v29 = vsel %vm214_vm3, %v187_v13, %v199_v18  ;;  %v215_v30 = vsel %vm212_vm4, %v182_v14, %v194_v19  ;;  %v216_v31 = vsel %vm212_vm4, %v183_v15, %v195_v20 }
  0xad   : > { %v229_v32 = vmul.f32 1.442695, %v219_v28  ;;  %v231_v33 = vmul.f32 1.442695, %v220_v29  ;;  %v221_v34 = vmul.f32 1.442695, %v215_v30 }
  0xae   : > { %v223_v35 = vmul.f32 1.442695, %v216_v31  ;;  %v855_v36 = vpop.permute.xlu0 %207 }
  0xaf   : > { %567 = vpow2.f32 %v229_v32  ;;  %vm213_vm5 = vcmp.eq.s32.totalorder %v855_v36, 1  ;;  %v274_v39 = vpop.permute.xlu1 %273 }
  0xb0   : > { %569 = vpow2.f32 %v231_v33  ;;  %v217_v40 = vsel %vm213_vm5, %v184_v21, %v196_v26  ;;  %v218_v41 = vsel %vm213_vm5, %v185_v22, %v197_v27  ;;  %v286_v14 = vmul.f32 %v274_v39, %v269_v5 }
  0xb1   : > { %571 = vpow2.f32 %v221_v34  ;;  %v225_v42 = vmul.f32 1.442695, %v217_v40  ;;  %v227_v43 = vmul.f32 1.442695, %v218_v41  ;;  %v287_v15 = vmul.f32 %v274_v39, %v270_v6 }
  0xb2   : > { %573 = vpow2.f32 %v223_v35 }
  0xb3   : > { %575 = vpow2.f32 %v225_v42  ;;  %v284_v46 = vpop.permute.xlu1 %283  ;;  %v279_v56 = vpop.permute.xlu0 %278 }
  0xb4   : > { %577 = vpow2.f32 %v227_v43  ;;  %v288_v12 = vmul.f32 %v279_v56, %v269_v5  ;;  %v290_v17 = vmul.f32 %v284_v46, %v269_v5  ;;  %v289_v18 = vmul.f32 %v279_v56, %v270_v6 }
  0xb5   : > { %v291_v20 = vmul.f32 %v284_v46, %v270_v6 }
  0xb8   : > { %v294_v49 = vpop.permute.xlu1 %293  ;;  %v298_v7 = vpop.permute.xlu0 %297 }
  0xb9   : > { %v304_v8 = vmul.f32 %v294_v49, %v265_v50  ;;  %v305_v9 = vmul.f32 %v294_v49, %v266_v51  ;;  %v306_v13 = vmul.f32 %v298_v7, %v265_v50  ;;  %v307_v19 = vmul.f32 %v298_v7, %v266_v51 }
  0xbb   : > { %v310_v21 = vadd.f32 %v304_v8, %v286_v14  ;;  %v311_v22 = vadd.f32 %v305_v9, %v287_v15  ;;  %v312_v26 = vadd.f32 %v306_v13, %v288_v12  ;;  %v313_v31 = vadd.f32 %v307_v19, %v289_v18 }
  0xbc   : > { %v568_v52 = vpop.eup %567  ;;  %v302_v55 = vpop.permute.xlu1 %301 }
  0xbd   : > { %v570_v53 = vpop.eup %569  ;;  %v237_v54 = vadd.f32 1.0, %v568_v52  ;;  %v308_v11 = vmul.f32 %v302_v55, %v265_v50  ;;  %v309_v16 = vmul.f32 %v302_v55, %v266_v51  ;;  %v328_v28 = vpop.permute.xlu0 %327  ;;  %v316_v33 = vmul.f32 8.0, %v310_v21 }
  0xbe   : > { %v572_v57 = vpop.eup %571  ;;  %v238_v58 = vadd.f32 1.0, %v570_v53  ;;  %v317_v34 = vmul.f32 8.0, %v311_v22  ;;  %v318_v39 = vmul.f32 8.0, %v312_v26  ;;  %v319_v50 = vmul.f32 8.0, %v313_v31 }
  0xbf   : > { %v574_v59 = vpop.eup %573  ;;  %579 = vrcp.f32 %v237_v54  ;;  %v233_v60 = vadd.f32 1.0, %v572_v57  ;;  %v314_v25 = vadd.f32 %v308_v11, %v290_v17  ;;  %v315_v29 = vadd.f32 %v309_v16, %v291_v20 }
  0xc0   : > { %v863_v63 = vpop.eup %575  ;;  %581 = vrcp.f32 %v238_v58  ;;  %v234_v0 = vadd.f32 1.0, %v574_v59 }
  0xc1   : > { %v865_v1 = vpop.eup %577  ;;  %583 = vrcp.f32 %v233_v60  ;;  %v235_v2 = vadd.f32 1.0, %v863_v63  ;;  %v324_v3 = vpop.permute.xlu1 %323  ;;  %v320_v38 = vmul.f32 8.0, %v314_v25  ;;  %v321_v44 = vmul.f32 8.0, %v315_v29 }
  0xc2   : > { %585 = vrcp.f32 %v234_v0  ;;  %v236_v4 = vadd.f32 1.0, %v865_v1  ;;  %v351_v23 = vpop.permute.xlu0 %350 }
  0xc3   : > { %587 = vrcp.f32 %v235_v2  ;;  %vm356_vm8 = vcmp.eq.s32.totalorder %v351_v23, 1 }
  0xc4   : > { %589 = vrcp.f32 %v236_v4 }
  0xc5   : > { %v332_v10 = vpop.permute.xlu1 %331 }
  0xca   : > { %v348_v27 = vpop.permute.xlu1 %347 }
  0xcb   : > { %vm355_vm7 = vcmp.eq.s32.totalorder %v348_v27, 1 }
  0xcc   : > { %v580_v30 = vpop.eup %579 }
  0xcd   : > { %v582_v32 = vpop.eup %581  ;;  %v249_v35 = vsel %vm214_vm3, %v568_v52, %v580_v30 }
  0xce   : > { %v584_v37 = vpop.eup %583  ;;  %v250_v40 = vsel %vm214_vm3, %v570_v53, %v582_v32  ;;  %v338_v41 = vmul.f32 %v332_v10, %v249_v35  ;;  %v354_v42 = vpop.permute.xlu1 %353 }
  0xcf   : > { %v586_v43 = vpop.eup %585  ;;  %v245_v45 = vsel %vm212_vm4, %v572_v57, %v584_v37  ;;  %v339_v46 = vmul.f32 %v332_v10, %v250_v40  ;;  %vm357_vm6 = vcmp.eq.s32.totalorder %v354_v42, 1 }
  0xd0   : > { %v588_v47 = vpop.eup %587  ;;  %v246_v48 = vsel %vm212_vm4, %v574_v59, %v586_v43  ;;  %v334_v49 = vmul.f32 %v324_v3, %v245_v45  ;;  %v344_v51 = vadd.f32 %v338_v41, %v320_v38 }
  0xd1   : > { %v590_v52 = vpop.eup %589  ;;  %v335_v53 = vmul.f32 %v324_v3, %v246_v48  ;;  %v247_v54 = vsel %vm213_vm5, %v863_v63, %v588_v47  ;;  %v345_v55 = vadd.f32 %v339_v46, %v321_v44 }
  0xd2   : > { %v340_v56 = vadd.f32 %v334_v49, %v316_v33  ;;  %v248_v24 = vsel %vm213_vm5, %v865_v1, %v590_v52  ;;  %v336_v57 = vmul.f32 %v328_v28, %v247_v54  ;;  %v362_v58 = vsel %vm357_vm6, 1.0, %v344_v51 }
  0xd3   : > { %v341_v59 = vadd.f32 %v335_v53, %v317_v34  ;;  %v337_v60 = vmul.f32 %v328_v28, %v248_v24  ;;  %v363_v61 = vsel %vm357_vm6, 1.0, %v345_v55  ;;  %368 = vst [vmem:[%s179_s21 + $0x20] sm:$0xff] %v362_v58 }
  0xd4   : > { %v358_v62 = vsel %vm355_vm7, 1.0, %v340_v56  ;;  %369 = vst [vmem:[%s179_s21 + $0x28] sm:$0xff] %v363_v61  ;;  %v342_v36 = vadd.f32 %v336_v57, %v318_v39 }
  0xd5   : > { %v359_v63 = vsel %vm355_vm7, 1.0, %v341_v59  ;;  %364 = vst [vmem:[%s179_s21] sm:$0xff] %v358_v62  ;;  %v343_v0 = vadd.f32 %v337_v60, %v319_v50 }
  0xd6   : > { %365 = vst [vmem:[%s179_s21 + $0x8] sm:$0xff] %v359_v63  ;;  %v360_v1 = vsel %vm356_vm8, 1.0, %v342_v36 }
  0xd7   : > { %v361_v2 = vsel %vm356_vm8, 1.0, %v343_v0  ;;  %366 = vst [vmem:[%s179_s21 + $0x10] sm:$0xff] %v360_v1 }
  0xd8   : > { %367 = vst [vmem:[%s179_s21 + $0x18] sm:$0xff] %v361_v2 }
  0xd9   : > { %632 = shalt.err (!%p629_p6)
}
  0xda   : > { %s633_s27 = scalar_lea.hbm %s895_s15, 768  ;;  %s637_s30 = scalar_lea.hbm %s945_s2, 1536 }
  0xdb   : > { %p634_p4 = scmp.ne.s32.totalorder %s895_s15, %s633_s27  ;;  %p638_p13 = scmp.lt.s32.totalorder %s895_s15, %s945_s2 }
  0xdc   : > { %p639_p2 = scmp.lt.s32.totalorder %s637_s30, %s633_s27 }
  0xdd   : > { %p635_p7 = pnand %p634_p4, %p778_p9 }
  0xde   : > { %p640_p8 = por %p639_p2, %p638_p13 }
  0xdf   : > { %p636_p10 = pneg %p635_p7 }
  0xe1   : > { %p641_p12 = pnand %p640_p8, %p636_p10 }
  0xe3   : > { %644 = shalt.err (!%p641_p12)
}
  0xe4   : > { %s710_s5 = smov 256   ;;  %s711_s21 = smov 16  }
  0xe5   : > { %488 = dma.vmem_to_hbm [thread:$0]  (%p778_p9), %s888_s6, 768, %s895_s15, %s371_s16, %s710_s5, %s710_s5, %s711_s21  }
  0xe6 PF: > { %s401_s7 = sand.u32 1, %s679_s9   ;;  %p951_p0 = scmp.ge.s32.totalorder %s699_s14, 2 }
  0xe7   : > { %s402_s12 = scalar_lea.sflag [#allocation4], %s401_s7 }
  0xe8   : > { %p495_p1 = pnand %p951_p0, %p785_p11 }
  0xea   : > { %p496_p3 = pneg %p495_p1 }
  0xec   : > { %674 = dma.done.wait (%p496_p3), %s402_s12, 768  }
  0xed   : > { %676 = vsyncadd (%p496_p3), %s402_s12, 4294966528  ;;  %s18_s14 = sadd.s32 1, %s699_s14   ;;  %s952_s9 = smov %s683_s10 }
  0xee   : > { %p15_p5 = scmp.ge.s32.totalorder %s18_s14, 4   ;;  %s953_s10 = smov %s687_s11 }
  0xef   : > { %s954_s11 = smov %s783_s23  ;;  %s955_s12 = smov %s695_s13 }
  0xf0   : > { %s956_s13 = smov %s958_s17  ;;  %17 = sbr.rel (!%p15_p5) target bundleno = 6 (0x6), region = 73 }
  0xf5   :  { %407 = vsyncpa [#allocation3], 1 }
  0xf6   :  { %409 = vsyncpa [#allocation3 + $0x1], 1 }
  0xf7   :  { %410 = vsyncpa [#allocation4], 1 }
  0xf8   :  { %412 = vsyncpa [#allocation4 + $0x1], 1 }

</bundles_post_ra>
